<compile_context>
chip_gen: v6e
topology: v6e:2x2x1
jax: 0.10.0
libtpu: 0.0.40
codegen_flags: <defaults>
</compile_context>

<pallas_src>
import jax
import jax.numpy as jnp
from jax.experimental import pallas as pl
from jax.experimental.pallas import tpu as pltpu

LANE = 128      # TPU lane width (last dim)
SUBLANE = 8     # TPU sublane width (second-to-last dim, f32)
MAX_BATCH_TILE = 256


def _round_up(n: int, m: int) -> int:
    return ((n + m - 1) // m) * m


def _make_fused_kernel(n_layers: int):
    """Build a kernel that runs `n_layers` fused Linear+Sigmoid layers.

    Kernel refs (all f32, VMEM, lane-padded to multiples of 128):
      x_ref : (TB, in0_p)
      then per layer l: w_ref_l (ip_p, op_p), b_ref_l (1, op_p)
      o_ref : (TB, out_p)
    """

    def kernel(*refs):
        x_ref = refs[0]
        o_ref = refs[-1]
        h = x_ref[...]
        for l in range(n_layers):                      # static unroll
            w_ref = refs[1 + 2 * l]
            b_ref = refs[2 + 2 * l]
            y = jnp.dot(h, w_ref[...], preferred_element_type=jnp.float32)
            y = y + b_ref[...]                         # broadcast over batch rows
            # sigmoid(y) = 1 / (1 + exp(-y)); exp goes to the EUP slot.
            h = pl.reciprocal(1.0 + jnp.exp(-y), approx=False)
        o_ref[...] = h

    return kernel


def digit_classifier_forward(x, params):
    """Fused forward pass: one pallas_call for the whole MLP.

    x:      (B, sizes[0]) float32
    params: list of (w_t, b) with w_t shaped (in, out) and b shaped (1, out)
    returns (B, sizes[-1]) float32
    """
    B, in0 = x.shape
    n_layers = len(params)
    out_dim = params[-1][0].shape[1]

    # Batch tiling: small batches -> one block; big batches -> grid of 256-row
    # blocks (parallel over megacore), weights stay resident.
    tb = min(_round_up(B, SUBLANE), MAX_BATCH_TILE)
    Bp = _round_up(B, tb)
    n_blocks = Bp // tb

    in0_p = _round_up(in0, LANE)
    out_p = _round_up(out_dim, LANE)

    # Zero-pad activations / weights / biases to lane-dense 128-wide tiles.
    # Zero weight rows for padded input lanes guarantee the sigmoid(0)=0.5
    # values in padded lanes never leak into the next layer.
    xp = jnp.zeros((Bp, in0_p), jnp.float32).at[:B, :in0].set(x)

    padded_args = []
    w_shapes = []
    for w_t, b in params:
        ip, op = w_t.shape
        ip_p, op_p = _round_up(ip, LANE), _round_up(op, LANE)
        wp = jnp.zeros((ip_p, op_p), jnp.float32).at[:ip, :op].set(w_t)
        bp = jnp.zeros((1, op_p), jnp.float32).at[:, :op].set(b)
        padded_args.extend([wp, bp])
        w_shapes.append((ip_p, op_p))

    in_specs = [pl.BlockSpec((tb, in0_p), lambda i: (i, 0))]
    for ip_p, op_p in w_shapes:
        # Same block every grid step -> weights/biases stay VMEM-resident.
        in_specs.append(pl.BlockSpec((ip_p, op_p), lambda i: (0, 0)))
        in_specs.append(pl.BlockSpec((1, op_p), lambda i: (0, 0)))

    out = pl.pallas_call(
        _make_fused_kernel(n_layers),
        out_shape=jax.ShapeDtypeStruct((Bp, out_p), jnp.float32),
        grid=(n_blocks,),
        in_specs=in_specs,
        out_specs=pl.BlockSpec((tb, out_p), lambda i: (i, 0)),
        compiler_params=pltpu.CompilerParams(
            dimension_semantics=("parallel",)),
    )(xp, *padded_args)

    return out[:B, :out_dim]


def init_params(sizes, key):
    """Deterministic init mimicking nn.Linear's default U(-1/sqrt(in), 1/sqrt(in)).

    Returns list of (w_t, b) with w_t already transposed to (in, out).
    """
    params = []
    for ip, op in zip(sizes, sizes[1:]):
        key, kw, kb = jax.random.split(key, 3)
        bound = 1.0 / jnp.sqrt(jnp.float32(ip))
        w = jax.random.uniform(kw, (op, ip), jnp.float32, -bound, bound)  # torch layout (out, in)
        b = jax.random.uniform(kb, (op,), jnp.float32, -bound, bound)
        params.append((w.T, b.reshape(1, op)))
    return params


if __name__ == "__main__":
    # Small, deterministic example consistent with the module:
    # config.sizes defines the MLP widths; last size = num_classes.
    sizes = (32, 64, 32, 10)
    batch = 8

    key = jax.random.PRNGKey(0)
    key, kx = jax.random.split(key)
    x = jax.random.normal(kx, (batch, sizes[0]), jnp.float32)

    params = init_params(sizes, key)

    fwd = jax.jit(digit_classifier_forward)
    out = fwd(x, params)
    out = jax.block_until_ready(out)

    # Sanity-check against a plain-JAX reference of the same forward pass.
    ref = x
    for w_t, b in params:
        ref = 1.0 / (1.0 + jnp.exp(-(ref @ w_t + b)))
    assert out.shape == (batch, sizes[-1])
    assert jnp.allclose(out, ref, atol=1e-5, rtol=1e-5)

    print("KERNEL_OK")

    # TODO(synk): training loop / DataLoader / model save-load from the PyTorch
    # module are host-side orchestration, not part of the forward kernel.
</pallas_src>

<mosaic_0001>
module attributes {stable_mosaic.version = 11 : i64} {
  func.func @kernel(%arg0: i32, %arg1: memref<8x128xf32, #tpu.memory_space<vmem>>, %arg2: memref<128x128xf32, #tpu.memory_space<vmem>>, %arg3: memref<1x128xf32, #tpu.memory_space<vmem>>, %arg4: memref<128x128xf32, #tpu.memory_space<vmem>>, %arg5: memref<1x128xf32, #tpu.memory_space<vmem>>, %arg6: memref<128x128xf32, #tpu.memory_space<vmem>>, %arg7: memref<1x128xf32, #tpu.memory_space<vmem>>, %arg8: memref<8x128xf32, #tpu.memory_space<vmem>>) attributes {dimension_semantics = [#tpu.dimension_semantics<parallel>], iteration_bounds = array<i64: 1>, scalar_prefetch = 0 : i64, scratch_operands = 0 : i64, tpu.core_type = #tpu.core_type<tc>, window_params = [{transform_indices = @transform_0, window_bounds = array<i64: 8, 128>}, {pipeline_mode = #tpu.pipeline_mode<synchronous>, transform_indices = @transform_1, window_bounds = array<i64: 128, 128>}, {pipeline_mode = #tpu.pipeline_mode<synchronous>, transform_indices = @transform_2, window_bounds = array<i64: 1, 128>}, {pipeline_mode = #tpu.pipeline_mode<synchronous>, transform_indices = @transform_3, window_bounds = array<i64: 128, 128>}, {pipeline_mode = #tpu.pipeline_mode<synchronous>, transform_indices = @transform_4, window_bounds = array<i64: 1, 128>}, {pipeline_mode = #tpu.pipeline_mode<synchronous>, transform_indices = @transform_5, window_bounds = array<i64: 128, 128>}, {pipeline_mode = #tpu.pipeline_mode<synchronous>, transform_indices = @transform_6, window_bounds = array<i64: 1, 128>}, {transform_indices = @transform_7, window_bounds = array<i64: 8, 128>}]} {
    %c0 = arith.constant 0 : index
    %c0_0 = arith.constant 0 : index
    %0 = vector.load %arg1[%c0, %c0_0] : memref<8x128xf32, #tpu.memory_space<vmem>>, vector<8x128xf32>
    %c0_1 = arith.constant 0 : index
    %c0_2 = arith.constant 0 : index
    %1 = vector.load %arg2[%c0_1, %c0_2] : memref<128x128xf32, #tpu.memory_space<vmem>>, vector<128x128xf32>
    %cst = arith.constant dense<0.000000e+00> : vector<8x128xf32>
    %2 = tpu.matmul %0, %1, %cst {dimension_numbers = #tpu.dot_dimension_numbers<[1], [0], [0], [1], [0, 0, 1, 1], [], []>} : vector<8x128xf32>, vector<128x128xf32>, vector<8x128xf32> -> vector<8x128xf32>
    %c0_3 = arith.constant 0 : index
    %c0_4 = arith.constant 0 : index
    %3 = vector.load %arg3[%c0_3, %c0_4] : memref<1x128xf32, #tpu.memory_space<vmem>>, vector<1x128xf32>
    %4 = vector.broadcast %3 : vector<1x128xf32> to vector<8x128xf32>
    %5 = arith.addf %2, %4 : vector<8x128xf32>
    %cst_5 = arith.constant 0.000000e+00 : f32
    %6 = vector.broadcast %cst_5 : f32 to vector<8x128xf32>
    %7 = arith.subf %6, %5 : vector<8x128xf32>
    %8 = math.exp %7 : vector<8x128xf32>
    %cst_6 = arith.constant 1.000000e+00 : f32
    %9 = vector.broadcast %cst_6 : f32 to vector<8x128xf32>
    %10 = arith.addf %9, %8 : vector<8x128xf32>
    %11 = tpu.reciprocal %10 : vector<8x128xf32> -> vector<8x128xf32>
    %c0_7 = arith.constant 0 : index
    %c0_8 = arith.constant 0 : index
    %12 = vector.load %arg4[%c0_7, %c0_8] : memref<128x128xf32, #tpu.memory_space<vmem>>, vector<128x128xf32>
    %cst_9 = arith.constant dense<0.000000e+00> : vector<8x128xf32>
    %13 = tpu.matmul %11, %12, %cst_9 {dimension_numbers = #tpu.dot_dimension_numbers<[1], [0], [0], [1], [0, 0, 1, 1], [], []>} : vector<8x128xf32>, vector<128x128xf32>, vector<8x128xf32> -> vector<8x128xf32>
    %c0_10 = arith.constant 0 : index
    %c0_11 = arith.constant 0 : index
    %14 = vector.load %arg5[%c0_10, %c0_11] : memref<1x128xf32, #tpu.memory_space<vmem>>, vector<1x128xf32>
    %15 = vector.broadcast %14 : vector<1x128xf32> to vector<8x128xf32>
    %16 = arith.addf %13, %15 : vector<8x128xf32>
    %cst_12 = arith.constant 0.000000e+00 : f32
    %17 = vector.broadcast %cst_12 : f32 to vector<8x128xf32>
    %18 = arith.subf %17, %16 : vector<8x128xf32>
    %19 = math.exp %18 : vector<8x128xf32>
    %cst_13 = arith.constant 1.000000e+00 : f32
    %20 = vector.broadcast %cst_13 : f32 to vector<8x128xf32>
    %21 = arith.addf %20, %19 : vector<8x128xf32>
    %22 = tpu.reciprocal %21 : vector<8x128xf32> -> vector<8x128xf32>
    %c0_14 = arith.constant 0 : index
    %c0_15 = arith.constant 0 : index
    %23 = vector.load %arg6[%c0_14, %c0_15] : memref<128x128xf32, #tpu.memory_space<vmem>>, vector<128x128xf32>
    %cst_16 = arith.constant dense<0.000000e+00> : vector<8x128xf32>
    %24 = tpu.matmul %22, %23, %cst_16 {dimension_numbers = #tpu.dot_dimension_numbers<[1], [0], [0], [1], [0, 0, 1, 1], [], []>} : vector<8x128xf32>, vector<128x128xf32>, vector<8x128xf32> -> vector<8x128xf32>
    %c0_17 = arith.constant 0 : index
    %c0_18 = arith.constant 0 : index
    %25 = vector.load %arg7[%c0_17, %c0_18] : memref<1x128xf32, #tpu.memory_space<vmem>>, vector<1x128xf32>
    %26 = vector.broadcast %25 : vector<1x128xf32> to vector<8x128xf32>
    %27 = arith.addf %24, %26 : vector<8x128xf32>
    %cst_19 = arith.constant 0.000000e+00 : f32
    %28 = vector.broadcast %cst_19 : f32 to vector<8x128xf32>
    %29 = arith.subf %28, %27 : vector<8x128xf32>
    %30 = math.exp %29 : vector<8x128xf32>
    %cst_20 = arith.constant 1.000000e+00 : f32
    %31 = vector.broadcast %cst_20 : f32 to vector<8x128xf32>
    %32 = arith.addf %31, %30 : vector<8x128xf32>
    %33 = tpu.reciprocal %32 : vector<8x128xf32> -> vector<8x128xf32>
    %c0_21 = arith.constant 0 : index
    %c0_22 = arith.constant 0 : index
    %34 = vector.load %arg8[%c0_21, %c0_22] : memref<8x128xf32, #tpu.memory_space<vmem>>, vector<8x128xf32>
    tpu.vector_store %arg8[%c0_21, %c0_22], %33 {strides = array<i32>} : memref<8x128xf32, #tpu.memory_space<vmem>>, vector<8x128xf32>,
    return
  }
  func.func @transform_0(%arg0: i32) -> (i32, i32) {
    %c0_i32 = arith.constant 0 : i32
    %c0_i32_0 = arith.constant 0 : i32
    return %arg0, %c0_i32 : i32, i32
  }
  func.func @transform_1(%arg0: i32) -> (i32, i32) {
    %c0_i32 = arith.constant 0 : i32
    %c0_i32_0 = arith.constant 0 : i32
    %c0_i32_1 = arith.constant 0 : i32
    return %c0_i32, %c0_i32_0 : i32, i32
  }
  func.func @transform_2(%arg0: i32) -> (i32, i32) {
    %c0_i32 = arith.constant 0 : i32
    %c0_i32_0 = arith.constant 0 : i32
    %c0_i32_1 = arith.constant 0 : i32
    return %c0_i32, %c0_i32_0 : i32, i32
  }
  func.func @transform_3(%arg0: i32) -> (i32, i32) {
    %c0_i32 = arith.constant 0 : i32
    %c0_i32_0 = arith.constant 0 : i32
    %c0_i32_1 = arith.constant 0 : i32
    return %c0_i32, %c0_i32_0 : i32, i32
  }
  func.func @transform_4(%arg0: i32) -> (i32, i32) {
    %c0_i32 = arith.constant 0 : i32
    %c0_i32_0 = arith.constant 0 : i32
    %c0_i32_1 = arith.constant 0 : i32
    return %c0_i32, %c0_i32_0 : i32, i32
  }
  func.func @transform_5(%arg0: i32) -> (i32, i32) {
    %c0_i32 = arith.constant 0 : i32
    %c0_i32_0 = arith.constant 0 : i32
    %c0_i32_1 = arith.constant 0 : i32
    return %c0_i32, %c0_i32_0 : i32, i32
  }
  func.func @transform_6(%arg0: i32) -> (i32, i32) {
    %c0_i32 = arith.constant 0 : i32
    %c0_i32_0 = arith.constant 0 : i32
    %c0_i32_1 = arith.constant 0 : i32
    return %c0_i32, %c0_i32_0 : i32, i32
  }
  func.func @transform_7(%arg0: i32) -> (i32, i32) {
    %c0_i32 = arith.constant 0 : i32
    %c0_i32_0 = arith.constant 0 : i32
    return %arg0, %c0_i32 : i32, i32
  }
}

</mosaic_0001>

<bundles_post_ra>
// kernel: digit_classifier_forward.1
= control target key start
LH: loop header
LB: loop body
LE: loop exit
PB: predicated region body
PF: predicated region fallthrough
CT: control target
= control target key end

     0   :  { %v533_v1 = vmov 0.0   ;;  %vm534_vm0 = vmmov 0   ;;  %s789_s0 = inlined_call_operand.vmem [shape: f32[8,128], index: 0, kind: input, shape index: {}]   ;;  %s790_s1 = inlined_call_operand.vmem [shape: f32[128,128], index: 1, kind: input, shape index: {}]   ;;  %s791_s2 = inlined_call_operand.vmem [shape: f32[1,128], index: 2, kind: input, shape index: {}]   ;;  %s792_s3 = inlined_call_operand.vmem [shape: f32[128,128], index: 3, kind: input, shape index: {}]   ;;  %s793_s4 = inlined_call_operand.vmem [shape: f32[1,128], index: 4, kind: input, shape index: {}]   ;;  %s794_s5 = inlined_call_operand.vmem [shape: f32[128,128], index: 5, kind: input, shape index: {}]   ;;  %s795_s6 = inlined_call_operand.vmem [shape: f32[1,128], index: 6, kind: input, shape index: {}]   ;;  %s796_s7 = inlined_call_operand.hbm [shape: f32[8,128], index: 7, kind: output, shape index: {}]  }
   0x1   :  { %v43_v0 = vld [vmem:[%s790_s1 + $0x78] sm:$0xff]  ;;  %391 = vmatprep.subr.mxu0 %v533_v1  ;;  %v42_v2 = vld [vmem:[%s790_s1 + $0x70] sm:$0xff]  ;;  %423 = vmatprep.mubr.msk.f32.mxu0 %vm534_vm0, %v533_v1  ;;  %v41_v3 = vld [vmem:[%s790_s1 + $0x68] sm:$0xff] }
   0x2   :  { %392 = vmatpush3.msra.mxu0 %v43_v0  ;;  %426 = vmatprep.subr.mxu1 %v533_v1  ;;  %v40_v4 = vld [vmem:[%s790_s1 + $0x60] sm:$0xff] }
   0x3   :  { %393 = vmatprep.subr.mxu0 %v533_v1  ;;  %458 = vmatprep.mubr.msk.f32.mxu1 %vm534_vm0, %v533_v1 }
   0x4   :  { %394 = vmatpush3.msra.mxu0 %v42_v2 }
   0x5   :  { %395 = vmatprep.subr.mxu0 %v533_v1 }
   0x6   :  { %396 = vmatpush3.msra.mxu0 %v41_v3 }
   0x7   :  { %12 = vsyncpa [#allocation3], 0  ;;  %397 = vmatprep.subr.mxu0 %v533_v1  ;;  %v39_v5 = vld [vmem:[%s790_s1 + $0x58] sm:$0xff]  ;;  %v38_v6 = vld [vmem:[%s790_s1 + $0x50] sm:$0xff] }
   0x8   :  { %398 = vmatpush3.msra.mxu0 %v40_v4  ;;  %v37_v7 = vld [vmem:[%s790_s1 + $0x48] sm:$0xff]  ;;  %v36_v8 = vld [vmem:[%s790_s1 + $0x40] sm:$0xff]  ;;  %v35_v9 = vld [vmem:[%s790_s1 + $0x38] sm:$0xff] }
   0x9   :  { %399 = vmatprep.subr.mxu0 %v533_v1  ;;  %v34_v10 = vld [vmem:[%s790_s1 + $0x30] sm:$0xff]  ;;  %v33_v11 = vld [vmem:[%s790_s1 + $0x28] sm:$0xff]  ;;  %v32_v12 = vld [vmem:[%s790_s1 + $0x20] sm:$0xff] }
   0xa   :  { %400 = vmatpush3.msra.mxu0 %v39_v5  ;;  %v31_v13 = vld [vmem:[%s790_s1 + $0x18] sm:$0xff]  ;;  %v30_v14 = vld [vmem:[%s790_s1 + $0x10] sm:$0xff]  ;;  %v29_v15 = vld [vmem:[%s790_s1 + $0x8] sm:$0xff] }
   0xb   :  { %401 = vmatprep.subr.mxu0 %v533_v1  ;;  %v28_v16 = vld [vmem:[%s790_s1] sm:$0xff]  ;;  %v141_v18 = vld [vmem:[%s792_s3 + $0x78] sm:$0xff]  ;;  %v140_v19 = vld [vmem:[%s792_s3 + $0x70] sm:$0xff] }
   0xc   :  { %402 = vmatpush3.msra.mxu0 %v38_v6  ;;  %v27_v17 = vld [vmem:[%s789_s0] sm:$0xff]  ;;  %427 = vmatpush3.msra.mxu1 %v141_v18  ;;  %v139_v20 = vld [vmem:[%s792_s3 + $0x68] sm:$0xff]  ;;  %v137_v22 = vld [vmem:[%s792_s3 + $0x58] sm:$0xff] }
   0xd   :  { %403 = vmatprep.subr.mxu0 %v533_v1  ;;  %428 = vmatprep.subr.mxu1 %v533_v1  ;;  %v138_v21 = vld [vmem:[%s792_s3 + $0x60] sm:$0xff]  ;;  %v136_v23 = vld [vmem:[%s792_s3 + $0x50] sm:$0xff]  ;;  %v135_v24 = vld [vmem:[%s792_s3 + $0x48] sm:$0xff] }
   0xe   :  { %404 = vmatpush3.msra.mxu0 %v37_v7  ;;  %429 = vmatpush3.msra.mxu1 %v140_v19  ;;  %v134_v25 = vld [vmem:[%s792_s3 + $0x40] sm:$0xff]  ;;  %v133_v26 = vld [vmem:[%s792_s3 + $0x38] sm:$0xff]  ;;  %v132_v27 = vld [vmem:[%s792_s3 + $0x30] sm:$0xff] }
   0xf   :  { %405 = vmatprep.subr.mxu0 %v533_v1  ;;  %430 = vmatprep.subr.mxu1 %v533_v1  ;;  %v131_v28 = vld [vmem:[%s792_s3 + $0x28] sm:$0xff]  ;;  %v130_v29 = vld [vmem:[%s792_s3 + $0x20] sm:$0xff]  ;;  %v129_v30 = vld [vmem:[%s792_s3 + $0x18] sm:$0xff] }
  0x10   :  { %406 = vmatpush3.msra.mxu0 %v36_v8  ;;  %431 = vmatpush3.msra.mxu1 %v139_v20  ;;  %v128_v31 = vld [vmem:[%s792_s3 + $0x10] sm:$0xff]  ;;  %v127_v32 = vld [vmem:[%s792_s3 + $0x8] sm:$0xff]  ;;  %v126_v33 = vld [vmem:[%s792_s3] sm:$0xff] }
  0x11   :  { %407 = vmatprep.subr.mxu0 %v533_v1  ;;  %432 = vmatprep.subr.mxu1 %v533_v1  ;;  %v337_v34 = vld [vmem:[%s791_s2] ss:$0 sm:$0xff]  ;;  %v239_v43 = vld [vmem:[%s794_s5 + $0x78] sm:$0xff]  ;;  %v238_v44 = vld [vmem:[%s794_s5 + $0x70] sm:$0xff] }
  0x12   :  { %408 = vmatpush3.msra.mxu0 %v35_v9  ;;  %433 = vmatpush3.msra.mxu1 %v138_v21  ;;  %v237_v45 = vld [vmem:[%s794_s5 + $0x68] sm:$0xff]  ;;  %v236_v46 = vld [vmem:[%s794_s5 + $0x60] sm:$0xff]  ;;  %v235_v47 = vld [vmem:[%s794_s5 + $0x58] sm:$0xff] }
  0x13   :  { %409 = vmatprep.subr.mxu0 %v533_v1  ;;  %434 = vmatprep.subr.mxu1 %v533_v1  ;;  %v234_v48 = vld [vmem:[%s794_s5 + $0x50] sm:$0xff]  ;;  %v233_v49 = vld [vmem:[%s794_s5 + $0x48] sm:$0xff]  ;;  %v232_v50 = vld [vmem:[%s794_s5 + $0x40] sm:$0xff] }
  0x14   :  { %410 = vmatpush3.msra.mxu0 %v34_v10  ;;  %435 = vmatpush3.msra.mxu1 %v137_v22  ;;  %v231_v51 = vld [vmem:[%s794_s5 + $0x38] sm:$0xff]  ;;  %v230_v52 = vld [vmem:[%s794_s5 + $0x30] sm:$0xff]  ;;  %v229_v53 = vld [vmem:[%s794_s5 + $0x28] sm:$0xff] }
  0x15   :  { %411 = vmatprep.subr.mxu0 %v533_v1  ;;  %436 = vmatprep.subr.mxu1 %v533_v1  ;;  %v228_v54 = vld [vmem:[%s794_s5 + $0x20] sm:$0xff]  ;;  %v227_v55 = vld [vmem:[%s794_s5 + $0x18] sm:$0xff]  ;;  %v226_v56 = vld [vmem:[%s794_s5 + $0x10] sm:$0xff] }
  0x16   :  { %412 = vmatpush3.msra.mxu0 %v33_v11  ;;  %437 = vmatpush3.msra.mxu1 %v136_v23  ;;  %v225_v57 = vld [vmem:[%s794_s5 + $0x8] sm:$0xff]  ;;  %v224_v58 = vld [vmem:[%s794_s5] sm:$0xff] }
  0x17   :  { %413 = vmatprep.subr.mxu0 %v533_v1  ;;  %438 = vmatprep.subr.mxu1 %v533_v1  ;;  %v338_v59 = vld [vmem:[%s793_s4] ss:$0 sm:$0xff]  ;;  %s535_s4 = smov [#allocation2]  }
  0x18   :  { %414 = vmatpush3.msra.mxu0 %v32_v12  ;;  %439 = vmatpush3.msra.mxu1 %v135_v24  ;;  %s329_s25 = sshll.u32 %s535_s4, 4  ;;  %s330_s25 = int_to_ptr.vmem [resolvable:$true] %s329_s25 }
  0x19   :  { %415 = vmatprep.subr.mxu0 %v533_v1  ;;  %440 = vmatprep.subr.mxu1 %v533_v1  ;;  %s511_s26 = scalar_lea.vmem %s330_s25, 128  ;;  %p516_p1 = scmp.lt.s32.totalorder %s330_s25, %s330_s25 }
  0x1a   :  { %416 = vmatpush3.msra.mxu0 %v31_v13  ;;  %441 = vmatpush3.msra.mxu1 %v134_v25  ;;  %p512_p0 = scmp.ne.s32.totalorder %s330_s25, %s511_s26  ;;  %p517_p2 = scmp.lt.s32.totalorder %s511_s26, %s511_s26 }
  0x1b   :  { %417 = vmatprep.subr.mxu0 %v533_v1  ;;  %442 = vmatprep.subr.mxu1 %v533_v1 }
  0x1c   :  { %418 = vmatpush3.msra.mxu0 %v30_v14  ;;  %443 = vmatpush3.msra.mxu1 %v133_v26  ;;  %p518_p3 = por %p517_p2, %p516_p1 }
  0x1d   :  { %419 = vmatprep.subr.mxu0 %v533_v1  ;;  %444 = vmatprep.subr.mxu1 %v533_v1 }
  0x1e   :  { %420 = vmatpush3.msra.mxu0 %v29_v15  ;;  %445 = vmatpush3.msra.mxu1 %v132_v27  ;;  %p519_p4 = pnand %p518_p3, %p512_p0 }
  0x1f   :  { %421 = vmatprep.subr.mxu0 %v533_v1  ;;  %446 = vmatprep.subr.mxu1 %v533_v1 }
  0x20   :  { %422 = vmatpush3.msra.mxu0 %v28_v16  ;;  %447 = vmatpush3.msra.mxu1 %v131_v28 }
  0x21   :  { %424 = vmatmul.mubr.f32.vlgmr.msra.gmra.mxu0 %v27_v17  ;;  %461 = vmatprep.subr.mxu0 %v533_v1 }
  0x22   :  { %493 = vmatprep.mubr.msk.f32.mxu0 %vm534_vm0, %v533_v1  ;;  %448 = vmatprep.subr.mxu1 %v533_v1 }
  0x23   :  { %449 = vmatpush3.msra.mxu1 %v130_v29  ;;  %462 = vmatpush3.msra.mxu0 %v239_v43 }
  0x24   :  { %450 = vmatprep.subr.mxu1 %v533_v1  ;;  %463 = vmatprep.subr.mxu0 %v533_v1 }
  0x25   :  { %451 = vmatpush3.msra.mxu1 %v129_v30  ;;  %464 = vmatpush3.msra.mxu0 %v238_v44 }
  0x26   :  { %452 = vmatprep.subr.mxu1 %v533_v1  ;;  %465 = vmatprep.subr.mxu0 %v533_v1 }
  0x27   :  { %453 = vmatpush3.msra.mxu1 %v128_v31  ;;  %466 = vmatpush3.msra.mxu0 %v237_v45 }
  0x28   :  { %454 = vmatprep.subr.mxu1 %v533_v1  ;;  %467 = vmatprep.subr.mxu0 %v533_v1 }
  0x29   :  { %455 = vmatpush3.msra.mxu1 %v127_v32  ;;  %468 = vmatpush3.msra.mxu0 %v236_v46 }
  0x2a   :  { %456 = vmatprep.subr.mxu1 %v533_v1  ;;  %469 = vmatprep.subr.mxu0 %v533_v1 }
  0x2b   :  { %457 = vmatpush3.msra.mxu1 %v126_v33  ;;  %470 = vmatpush3.msra.mxu0 %v235_v47 }
  0x2c   :  { %471 = vmatprep.subr.mxu0 %v533_v1 }
  0x2d   :  { %472 = vmatpush3.msra.mxu0 %v234_v48 }
  0x2e   :  { %473 = vmatprep.subr.mxu0 %v533_v1 }
  0x2f   :  { %474 = vmatpush3.msra.mxu0 %v233_v49 }
  0x30   :  { %475 = vmatprep.subr.mxu0 %v533_v1 }
  0x31   :  { %476 = vmatpush3.msra.mxu0 %v232_v50 }
  0x32   :  { %477 = vmatprep.subr.mxu0 %v533_v1 }
  0x33   :  { %478 = vmatpush3.msra.mxu0 %v231_v51 }
  0x34   :  { %479 = vmatprep.subr.mxu0 %v533_v1 }
  0x35   :  { %480 = vmatpush3.msra.mxu0 %v230_v52 }
  0x36   :  { %481 = vmatprep.subr.mxu0 %v533_v1 }
  0x37   :  { %482 = vmatpush3.msra.mxu0 %v229_v53 }
  0x38   :  { %483 = vmatprep.subr.mxu0 %v533_v1 }
  0x39   :  { %484 = vmatpush3.msra.mxu0 %v228_v54 }
  0x3a   :  { %485 = vmatprep.subr.mxu0 %v533_v1 }
  0x3b   :  { %486 = vmatpush3.msra.mxu0 %v227_v55 }
  0x3c   :  { %487 = vmatprep.subr.mxu0 %v533_v1 }
  0x3d   :  { %488 = vmatpush3.msra.mxu0 %v226_v56 }
  0x3e   :  { %489 = vmatprep.subr.mxu0 %v533_v1 }
  0x3f   :  { %490 = vmatpush3.msra.mxu0 %v225_v57 }
  0x40   :  { %491 = vmatprep.subr.mxu0 %v533_v1  ;;  %v339_v1 = vld [vmem:[%s795_s6] ss:$0 sm:$0xff] }
  0x41   :  { %492 = vmatpush3.msra.mxu0 %v224_v58 }
  0xe1   :  { %v117_v35 = vpop.f32.mrf.mxu0 }
  0xe2   :  { %v118_v36 = vadd.f32 %v337_v34, %v117_v35 }
  0xe3   :  { %v425_v37 = vpop.f32.mrf.mxu0 }
  0xe4   :  { %v121_v38 = vsub.f32 0.0, %v118_v36 }
  0xe6   :  { %v122_v39 = vmul.f32 1.442695, %v121_v38 }
  0xe8   :  { %499 = vpow2.f32 %v122_v39 }
  0xf5   :  { %v500_v40 = vpop.eup %499 }
  0xf6   :  { %v124_v41 = vadd.f32 1.0, %v500_v40 }
  0xf8   :  { %501 = vrcp.f32 %v124_v41 }
 0x105   :  { %v502_v42 = vpop.eup %501 }
 0x106   :  { %459 = vmatmul.mubr.f32.vlgmr.msra.gmra.mxu1 %v502_v42 }
 0x1c6   :  { %v215_v60 = vpop.f32.mrf.mxu1 }
 0x1c7   :  { %v216_v61 = vadd.f32 %v338_v59, %v215_v60 }
 0x1c8   :  { %v460_v62 = vpop.f32.mrf.mxu1 }
 0x1c9   :  { %v219_v63 = vsub.f32 0.0, %v216_v61 }
 0x1cb   :  { %v220_v0 = vmul.f32 1.442695, %v219_v63 }
 0x1cd   :  { %503 = vpow2.f32 %v220_v0 }
 0x1da   :  { %v504_v2 = vpop.eup %503 }
 0x1db   :  { %v222_v3 = vadd.f32 1.0, %v504_v2 }
 0x1dd   :  { %505 = vrcp.f32 %v222_v3 }
 0x1ea   :  { %v506_v4 = vpop.eup %505 }
 0x1eb   :  { %494 = vmatmul.mubr.f32.vlgmr.msra.gmra.mxu0 %v506_v4 }
 0x2ab   :  { %v313_v5 = vpop.f32.mrf.mxu0 }
 0x2ac   :  { %v314_v6 = vadd.f32 %v339_v1, %v313_v5 }
 0x2ad   :  { %v495_v7 = vpop.f32.mrf.mxu0 }
 0x2ae   :  { %v317_v8 = vsub.f32 0.0, %v314_v6 }
 0x2b0   :  { %v318_v9 = vmul.f32 1.442695, %v317_v8 }
 0x2b2   :  { %507 = vpow2.f32 %v318_v9 }
 0x2bf   :  { %v508_v10 = vpop.eup %507 }
 0x2c0   :  { %v320_v11 = vadd.f32 1.0, %v508_v10 }
 0x2c2   :  { %509 = vrcp.f32 %v320_v11 }
 0x2cf   :  { %v510_v12 = vpop.eup %509 }
 0x2d0   :  { %322 = vst [vmem:[#allocation2] sm:$0xff] %v510_v12 }
 0x2d1   :  { %522 = shalt.err (!%p519_p4)
}
 0x2d2   :  { %332 = dma.vmem_to_hbm [thread:$0]  %s330_s25, 128, %s796_s7, [#allocation3]  }
 0x2d3   :  { %531 = dma.done.wait [#allocation3], 128  }
 0x2d4   :  { %532 = vsyncadd [#allocation3], 4294967168 }
 0x2d5   :  { %336 = vsyncpa [#allocation3], 1 }

</bundles_post_ra>
